<compile_context>
chip_gen: v7x
topology: tpu7x:2x2x1
jax: 0.10.0
libtpu: 0.0.40
codegen_flags: <defaults>
</compile_context>

<pallas_src>
import jax
import jax.numpy as jnp
from jax.experimental import pallas as pl
from jax.experimental.pallas import tpu as pltpu


def _linreg_kernel(w_ref, b_ref, x_ref, o_ref):
    # w_ref, b_ref: SMEM scalars (1, 1); x_ref / o_ref: VMEM tiles (VPU work).
    x = x_ref[...]
    w = w_ref[0, 0].astype(x.dtype)
    b = b_ref[0, 0].astype(x.dtype)
    o_ref[...] = (x * w + b).astype(o_ref.dtype)


def _ceil_to(x: int, m: int) -> int:
    return -(-x // m) * m


def _floor_to(x: int, m: int) -> int:
    return (x // m) * m


def _min_sublane(dtype) -> int:
    # Minimum second-minor tile extent per element width.
    return {4: 8, 2: 16, 1: 32}.get(jnp.dtype(dtype).itemsize, 8)


def _target_block_bytes() -> int:
    # v5e: 4 MiB blocks already amortize the ~0.35 us/step overhead (<4%).
    # v6e/v7x (faster HBM): 8 MiB blocks cut per-step overhead further.
    try:
        kind = jax.devices()[0].device_kind.lower()
    except Exception:
        return 4 << 20
    if "v5 lite" in kind or "v5lite" in kind or "v5e" in kind:
        return 4 << 20
    return 8 << 20


def _pick_block_rows(rows: int, lane: int, itemsize: int,
                     sublane: int, target_bytes: int) -> int:
    if rows <= sublane:
        # Single block whose row extent equals the full array dim (allowed by
        # the tiling rule even below the sublane multiple).
        return rows
    br = max(sublane, _floor_to(target_bytes // (lane * itemsize), sublane))
    cap = _floor_to(rows, sublane)                       # keep block <= array rows
    half = _ceil_to(pl.cdiv(rows, 2), sublane)           # >=2 grid blocks (2-TC v7x)
    return max(sublane, min(br, cap, half))


def _run(x2: jax.Array, w2: jax.Array, b2: jax.Array,
         block_rows: int, out_dtype) -> jax.Array:
    rows, lane = x2.shape
    grid = (pl.cdiv(rows, block_rows),)  # ragged last block handled by masking
    return pl.pallas_call(
        _linreg_kernel,
        out_shape=jax.ShapeDtypeStruct((rows, lane), out_dtype),
        grid_spec=pl.GridSpec(
            grid=grid,
            in_specs=[
                pl.BlockSpec((1, 1), lambda i: (0, 0), memory_space=pltpu.SMEM),
                pl.BlockSpec((1, 1), lambda i: (0, 0), memory_space=pltpu.SMEM),
                pl.BlockSpec((block_rows, lane), lambda i: (i, 0)),
            ],
            out_specs=pl.BlockSpec((block_rows, lane), lambda i: (i, 0)),
        ),
        compiler_params=pltpu.CompilerParams(
            dimension_semantics=("parallel",),
            # Pipeline footprint ~= 2 * (in + out) blocks <= 32 MiB at 8 MiB
            # blocks; 48 MiB scoped limit is safe on v5e/v6e/v7x.
            vmem_limit_bytes=48 * 1024 * 1024,
        ),
    )(w2, b2, x2)


def linear_regression(x: jax.Array, weights: jax.Array, bias: jax.Array) -> jax.Array:
    """y = x * weights + bias with scalar weights/bias (shape (1,)), any x shape."""
    orig_shape = x.shape
    out_dtype = x.dtype
    total = int(x.size)
    if total == 0:
        return x

    itemsize = jnp.dtype(x.dtype).itemsize
    sublane = _min_sublane(x.dtype)
    target_bytes = _target_block_bytes()

    w2 = weights.reshape(1, 1).astype(jnp.float32)
    b2 = bias.reshape(1, 1).astype(jnp.float32)

    # Aligned fast path: zero-copy reshape in, zero-copy reshape out.
    lane = next((l for l in (1024, 512, 256, 128) if total % l == 0), None)
    if lane is not None:
        rows = total // lane
        x2 = x.reshape(rows, lane)
        block_rows = _pick_block_rows(rows, lane, itemsize, sublane, target_bytes)
        y2 = _run(x2, w2, b2, block_rows, out_dtype)
        return y2.reshape(orig_shape)

    # Ragged fallback: one minimal pad (< lane extra elements), slice the tail.
    lane = 512 if total >= 512 else 128
    rows = pl.cdiv(total, lane)
    padded_total = rows * lane
    flat = jnp.pad(x.reshape(-1), (0, padded_total - total))
    x2 = flat.reshape(rows, lane)
    block_rows = _pick_block_rows(rows, lane, itemsize, sublane, target_bytes)
    y2 = _run(x2, w2, b2, block_rows, out_dtype)
    return y2.reshape(-1)[:total].reshape(orig_shape)


if __name__ == "__main__":
    key = jax.random.PRNGKey(0)
    kx1, kx2, kw, kb = jax.random.split(key, 4)

    # Parameters: same shapes as torch.randn(1) in the module's __init__.
    weights = jax.random.normal(kw, (1,), dtype=jnp.float32)
    bias = jax.random.normal(kb, (1,), dtype=jnp.float32)

    # Aligned input (2048 elems, divides 1024) -> zero-copy fast path.
    x_aligned = jax.random.normal(kx1, (2, 4, 16, 16), dtype=jnp.float32)
    # Ragged input (132 elems) -> padded/masked fallback path.
    x_ragged = jax.random.normal(kx2, (4, 33), dtype=jnp.float32)

    y_aligned = jax.block_until_ready(linear_regression(x_aligned, weights, bias))
    y_ragged = jax.block_until_ready(linear_regression(x_ragged, weights, bias))

    # Reference check in plain JAX (same broadcasting as PyTorch).
    ref_aligned = x_aligned * weights + bias
    ref_ragged = x_ragged * weights + bias
    assert y_aligned.shape == ref_aligned.shape
    assert y_ragged.shape == ref_ragged.shape
    assert jnp.allclose(y_aligned, ref_aligned, atol=1e-6, rtol=1e-6)
    assert jnp.allclose(y_ragged, ref_ragged, atol=1e-6, rtol=1e-6)

    print("KERNEL_OK")
</pallas_src>

<mosaic_0001>
module attributes {stable_mosaic.version = 11 : i64} {
  func.func @_linreg_kernel(%arg0: i32, %arg1: memref<1x1xf32, #tpu.memory_space<smem>>, %arg2: memref<1x1xf32, #tpu.memory_space<smem>>, %arg3: memref<2x1024xf32, #tpu.memory_space<vmem>>, %arg4: memref<2x1024xf32, #tpu.memory_space<vmem>>) attributes {dimension_semantics = [#tpu.dimension_semantics<parallel>], iteration_bounds = array<i64: 1>, scalar_prefetch = 0 : i64, scratch_operands = 0 : i64, tpu.core_type = #tpu.core_type<tc>, window_params = [{transform_indices = @transform_0, window_bounds = array<i64: 1, 1>}, {transform_indices = @transform_1, window_bounds = array<i64: 1, 1>}, {transform_indices = @transform_2, window_bounds = array<i64: 2, 1024>}, {transform_indices = @transform_3, window_bounds = array<i64: 2, 1024>}]} {
    %c0 = arith.constant 0 : index
    %c0_0 = arith.constant 0 : index
    %0 = vector.load %arg3[%c0, %c0_0] : memref<2x1024xf32, #tpu.memory_space<vmem>>, vector<2x1024xf32>
    %c0_1 = arith.constant 0 : index
    %c0_2 = arith.constant 0 : index
    %1 = memref.load %arg1[%c0_1, %c0_2] : memref<1x1xf32, #tpu.memory_space<smem>>
    %c0_3 = arith.constant 0 : index
    %c0_4 = arith.constant 0 : index
    %2 = memref.load %arg2[%c0_3, %c0_4] : memref<1x1xf32, #tpu.memory_space<smem>>
    %3 = vector.broadcast %1 : f32 to vector<2x1024xf32>
    %4 = arith.mulf %0, %3 : vector<2x1024xf32>
    %5 = vector.broadcast %2 : f32 to vector<2x1024xf32>
    %6 = arith.addf %4, %5 : vector<2x1024xf32>
    %c0_5 = arith.constant 0 : index
    %c0_6 = arith.constant 0 : index
    %7 = vector.load %arg4[%c0_5, %c0_6] : memref<2x1024xf32, #tpu.memory_space<vmem>>, vector<2x1024xf32>
    tpu.vector_store %arg4[%c0_5, %c0_6], %6 {strides = array<i32>} : memref<2x1024xf32, #tpu.memory_space<vmem>>, vector<2x1024xf32>,
    return
  }
  func.func @transform_0(%arg0: i32) -> (i32, i32) {
    %c0_i32 = arith.constant 0 : i32
    %c0_i32_0 = arith.constant 0 : i32
    %c0_i32_1 = arith.constant 0 : i32
    return %c0_i32, %c0_i32_0 : i32, i32
  }
  func.func @transform_1(%arg0: i32) -> (i32, i32) {
    %c0_i32 = arith.constant 0 : i32
    %c0_i32_0 = arith.constant 0 : i32
    %c0_i32_1 = arith.constant 0 : i32
    return %c0_i32, %c0_i32_0 : i32, i32
  }
  func.func @transform_2(%arg0: i32) -> (i32, i32) {
    %c0_i32 = arith.constant 0 : i32
    %c0_i32_0 = arith.constant 0 : i32
    return %arg0, %c0_i32 : i32, i32
  }
  func.func @transform_3(%arg0: i32) -> (i32, i32) {
    %c0_i32 = arith.constant 0 : i32
    %c0_i32_0 = arith.constant 0 : i32
    return %arg0, %c0_i32 : i32, i32
  }
}

</mosaic_0001>

<bundles_post_ra>
// kernel: tpu_custom_call.1
= control target key start
LH: loop header
LB: loop body
LE: loop exit
PB: predicated region body
PF: predicated region fallthrough
CT: control target
= control target key end

     0   :  { %10 = vsyncpa [#allocation5], 0  ;;  %s158_s0 = inlined_call_operand.<no memory space> [shape: f32[1,1], index: 0, kind: input, shape index: {}]   ;;  %s159_s1 = inlined_call_operand.<no memory space> [shape: f32[1,1], index: 1, kind: input, shape index: {}]   ;;  %s160_s2 = inlined_call_operand.hbm [shape: f32[2,1024], index: 2, kind: input, shape index: {}]   ;;  %s161_s3 = inlined_call_operand.hbm [shape: f32[2,1024], index: 3, kind: output, shape index: {}]  }
   0x1   :  { %11 = vsyncpa [#allocation6], 0  ;;  %s106_s12 = smov [#allocation4]   ;;  %s58_s16 = scalar_lea.hbm %s160_s2, 256 }
   0x2   :  { %s22_s13 = sshll.u32 %s106_s12, 4  ;;  %p59_p0 = scmp.ne.s32.totalorder %s160_s2, %s58_s16  ;;  %s23_s13 = int_to_ptr.vmem [resolvable:$true] %s22_s13 }
   0x3   :  { %p62_p1 = scmp.lt.u32.totalorder %s58_s16, %s160_s2 }
   0x5   :  { %p64_p2 = pnand %p62_p1, %p59_p0 }
   0x7   :  { %67 = shalt.err (!%p64_p2)
}
   0x8   :  { %s68_s21 = scalar_lea.vmem %s23_s13, 256  ;;  %p73_p4 = scmp.lt.s32.totalorder %s23_s13, %s23_s13 }
   0x9   :  { %p69_p3 = scmp.ne.s32.totalorder %s23_s13, %s68_s21  ;;  %p74_p5 = scmp.lt.s32.totalorder %s68_s21, %s68_s21 }
   0xb   :  { %p75_p6 = por %p74_p5, %p73_p4 }
   0xd   :  { %p76_p7 = pnand %p75_p6, %p69_p3 }
   0xf   :  { %79 = shalt.err (!%p76_p7)
}
  0x10   :  { %25 = dma.hbm_to_vmem [thread:$0]  %s160_s2, 256, %s23_s13, [#allocation5]  }
  0x11   :  { %102 = dma.done.wait [#allocation5], 256  }
  0x12   :  { %103 = vsyncadd [#allocation5], 4294967040  ;;  %v33_v0 = vstv %s158_s0  ;;  %v29_v1 = vld [vmem:[#allocation4] sm:$0xff]  ;;  %v36_v2 = vstv %s159_s1  ;;  %v30_v3 = vld [vmem:[#allocation4 + $0x8] sm:$0xff]  ;;  %s107_s28 = smov [#allocation7]  }
  0x13   :  { %s47_s29 = sshll.u32 %s107_s28, 4  ;;  %v34_v4 = vmul.f32 %v33_v0, %v29_v1  ;;  %v35_v5 = vmul.f32 %v33_v0, %v30_v3  ;;  %s48_s29 = int_to_ptr.vmem [resolvable:$true] %s47_s29 }
  0x14   :  { %s80_s2 = scalar_lea.vmem %s48_s29, 256  ;;  %p85_p9 = scmp.lt.s32.totalorder %s48_s29, %s48_s29 }
  0x15   :  { %v37_v6 = vadd.f32 %v36_v2, %v34_v4  ;;  %v38_v7 = vadd.f32 %v36_v2, %v35_v5  ;;  %p81_p8 = scmp.ne.s32.totalorder %s48_s29, %s80_s2  ;;  %p86_p10 = scmp.lt.s32.totalorder %s80_s2, %s80_s2 }
  0x17   :  { %39 = vst [vmem:[#allocation7] sm:$0xff] %v37_v6  ;;  %40 = vst [vmem:[#allocation7 + $0x8] sm:$0xff] %v38_v7  ;;  %p87_p11 = por %p86_p10, %p85_p9 }
  0x19   :  { %p88_p12 = pnand %p87_p11, %p81_p8 }
  0x1b   :  { %91 = shalt.err (!%p88_p12)
}
  0x1c   :  { %s92_s1 = scalar_lea.hbm %s161_s3, 256 }
  0x1d   :  { %p93_p13 = scmp.ne.s32.totalorder %s161_s3, %s92_s1  ;;  %p96_p0 = scmp.lt.u32.totalorder %s92_s1, %s161_s3 }
  0x1f   :  { %p98_p1 = pnand %p96_p0, %p93_p13 }
  0x21   :  { %101 = shalt.err (!%p98_p1)
}
  0x22   :  { %50 = dma.vmem_to_hbm [thread:$0]  %s48_s29, 256, %s161_s3, [#allocation6]  }
  0x23   :  { %104 = dma.done.wait [#allocation6], 256  }
  0x24   :  { %105 = vsyncadd [#allocation6], 4294967040 }
  0x25   :  { %54 = vsyncpa [#allocation5], 1 }
  0x26   :  { %55 = vsyncpa [#allocation6], 1 }

</bundles_post_ra>
